<compile_context>
chip_gen: v7x
topology: tpu7x:2x2x1
jax: 0.10.0
libtpu: 0.0.40
codegen_flags: <defaults>
</compile_context>

<pallas_src>
import functools

import jax
import jax.numpy as jnp
from jax.experimental import pallas as pl
from jax.experimental.pallas import tpu as pltpu


def _round_up(x, m):
    return ((x + m - 1) // m) * m


def _ensemble_fused_kernel(x_ref, w_ref, b_ref, o_ref):
    # x_ref: (TB, Dp), w_ref: (Dp, KAp), b_ref: (1, KAp), o_ref: (TB, KAp)
    y = jnp.dot(x_ref[...], w_ref[...], preferred_element_type=jnp.float32)
    o_ref[...] = (y + b_ref[...]).astype(o_ref.dtype)


def ensemble_forward_fused(x_padded, w_flat_pad, b_flat_pad, *, tb):
    """x_padded: [Bp, Dp], w_flat_pad: [Dp, KAp], b_flat_pad: [1, KAp] -> [Bp, KAp].

    Bp is a multiple of tb (tb is 8-aligned), Dp is a multiple of 8, KAp is a
    multiple of 128, so every store is unmasked and the single grid axis tiles
    only the batch dimension.
    """
    Bp, Dp = x_padded.shape
    Dw, KAp = w_flat_pad.shape
    assert Dw == Dp and b_flat_pad.shape == (1, KAp)
    assert Bp % tb == 0 and tb % 8 == 0 and KAp % 128 == 0 and Dp % 8 == 0

    grid_b = Bp // tb
    cost = pl.CostEstimate(
        flops=2 * Bp * Dp * KAp,
        transcendentals=0,
        bytes_accessed=4 * (Bp * Dp + Dp * KAp + KAp + Bp * KAp),
    )

    return pl.pallas_call(
        _ensemble_fused_kernel,
        out_shape=jax.ShapeDtypeStruct((Bp, KAp), jnp.float32),
        grid=(grid_b,),
        in_specs=[
            # x: one batch tile per grid step.
            pl.BlockSpec((tb, Dp), lambda i: (i, 0)),
            # Weights / bias: constant block index -> DMA'd once, VMEM-resident
            # across all batch tiles.
            pl.BlockSpec((Dp, KAp), lambda i: (0, 0)),
            pl.BlockSpec((1, KAp), lambda i: (0, 0)),
        ],
        out_specs=pl.BlockSpec((tb, KAp), lambda i: (i, 0)),
        compiler_params=pltpu.CompilerParams(
            dimension_semantics=("parallel",)),
        cost_estimate=cost,
    )(x_padded, w_flat_pad, b_flat_pad)


@functools.partial(jax.jit, static_argnames=("n_ensemble", "n_actions"))
def _ensemble_apply(x, w_flat_pad, b_flat_pad, *, n_ensemble, n_actions):
    """Returns a tuple of K arrays, each [B, A]; everything fused in one program."""
    x = x.astype(jnp.float32)
    B, D = x.shape
    Dp, KAp = w_flat_pad.shape
    KA = n_ensemble * n_actions

    # Batch tile: 8-aligned, capped at 256 rows; pad the batch to a multiple.
    tb = min(256, _round_up(B, 8))
    Bp = _round_up(B, tb)
    x_p = jnp.pad(x, ((0, Bp - B), (0, Dp - D)))

    out = ensemble_forward_fused(x_p, w_flat_pad, b_flat_pad, tb=tb)  # [Bp, KAp]
    # Slice back to the valid slab and split into heads (free layout plumbing,
    # all inside this jitted program).
    out = out[:B, :KA].reshape(B, n_ensemble, n_actions)
    return tuple(out[:, i, :] for i in range(n_ensemble))


class EnsembleNetPallas:
    """JAX/Pallas equivalent of the PyTorch EnsembleNet (K Linear heads)."""

    def __init__(self, n_ensemble, input_size=60, n_actions=4, key=None):
        if key is None:
            key = jax.random.PRNGKey(0)
        kw, kb = jax.random.split(key)
        # torch.nn.Linear default init: U(-1/sqrt(in), 1/sqrt(in)).
        bound = 1.0 / jnp.sqrt(jnp.float32(input_size))
        # Per-head params, stored [K, in, out] (pre-transposed vs torch's [out, in]).
        self.W = jax.random.uniform(
            kw, (n_ensemble, input_size, n_actions),
            minval=-bound, maxval=bound, dtype=jnp.float32)
        self.b = jax.random.uniform(
            kb, (n_ensemble, n_actions),
            minval=-bound, maxval=bound, dtype=jnp.float32)
        self.n_ensemble = n_ensemble
        self.n_actions = n_actions
        self.input_size = input_size

        # One-time fused + padded layout for the kernel:
        #   W_flat [D, K*A] -> zero-padded [D_pad, KA_pad] (D_pad % 8 == 0,
        #   KA_pad % 128 == 0) so stores are lane-dense and loads 8-aligned.
        KA = n_ensemble * n_actions
        D_pad = _round_up(input_size, 8)
        KA_pad = _round_up(KA, 128)
        w_flat = jnp.transpose(self.W, (1, 0, 2)).reshape(input_size, KA)
        b_flat = self.b.reshape(1, KA)
        self.W_flat_pad = (
            jnp.zeros((D_pad, KA_pad), jnp.float32)
            .at[:input_size, :KA].set(w_flat))
        self.b_flat_pad = (
            jnp.zeros((1, KA_pad), jnp.float32).at[:, :KA].set(b_flat))

    def __call__(self, x, k=None):
        heads = _ensemble_apply(
            x, self.W_flat_pad, self.b_flat_pad,
            n_ensemble=self.n_ensemble, n_actions=self.n_actions)
        # NOTE: `if k:` mirrors the original PyTorch module exactly (k=0 or
        # k=None falls through to the all-heads path). The single-head path
        # reuses the fused kernel output and just picks head k — no separate
        # narrow Pallas call.
        if k:
            return [heads[k]]
        return list(heads)


if __name__ == "__main__":
    key = jax.random.PRNGKey(0)
    k_params, k_x = jax.random.split(key)

    n_ensemble = 3
    input_size = 60
    n_actions = 4
    batch = 2

    net = EnsembleNetPallas(n_ensemble, input_size, n_actions, key=k_params)
    x = jax.random.normal(k_x, (batch, input_size), dtype=jnp.float32)

    # All-heads path (k=None), matching EnsembleNet.forward(x).
    heads = net(x)
    heads = [jax.block_until_ready(h) for h in heads]

    # Reference check against plain JAX.
    ref = [x @ net.W[i] + net.b[i] for i in range(n_ensemble)]
    for h, r in zip(heads, ref):
        assert h.shape == (batch, n_actions)
        assert jnp.allclose(h, r, atol=1e-5), "mismatch vs reference (all heads)"

    # Single-head path (k truthy), matching EnsembleNet.forward(x, k).
    single = net(x, k=1)
    single = [jax.block_until_ready(h) for h in single]
    assert len(single) == 1 and single[0].shape == (batch, n_actions)
    assert jnp.allclose(single[0], ref[1], atol=1e-5), "mismatch vs reference (head 1)"

    print("KERNEL_OK")
</pallas_src>

<mosaic_0001>
module attributes {stable_mosaic.version = 11 : i64} {
  func.func @_ensemble_fused_kernel(%arg0: i32, %arg1: memref<8x64xf32, #tpu.memory_space<vmem>>, %arg2: memref<64x128xf32, #tpu.memory_space<vmem>>, %arg3: memref<1x128xf32, #tpu.memory_space<vmem>>, %arg4: memref<8x128xf32, #tpu.memory_space<vmem>>) attributes {dimension_semantics = [#tpu.dimension_semantics<parallel>], iteration_bounds = array<i64: 1>, scalar_prefetch = 0 : i64, scratch_operands = 0 : i64, tpu.core_type = #tpu.core_type<tc>, window_params = [{transform_indices = @transform_0, window_bounds = array<i64: 8, 64>}, {pipeline_mode = #tpu.pipeline_mode<synchronous>, transform_indices = @transform_1, window_bounds = array<i64: 64, 128>}, {pipeline_mode = #tpu.pipeline_mode<synchronous>, transform_indices = @transform_2, window_bounds = array<i64: 1, 128>}, {transform_indices = @transform_3, window_bounds = array<i64: 8, 128>}]} {
    %c0 = arith.constant 0 : index
    %c0_0 = arith.constant 0 : index
    %0 = vector.load %arg1[%c0, %c0_0] : memref<8x64xf32, #tpu.memory_space<vmem>>, vector<8x64xf32>
    %c0_1 = arith.constant 0 : index
    %c0_2 = arith.constant 0 : index
    %1 = vector.load %arg2[%c0_1, %c0_2] : memref<64x128xf32, #tpu.memory_space<vmem>>, vector<64x128xf32>
    %cst = arith.constant dense<0.000000e+00> : vector<8x128xf32>
    %2 = tpu.matmul %0, %1, %cst {dimension_numbers = #tpu.dot_dimension_numbers<[1], [0], [0], [1], [0, 0, 1, 1], [], []>} : vector<8x64xf32>, vector<64x128xf32>, vector<8x128xf32> -> vector<8x128xf32>
    %c0_3 = arith.constant 0 : index
    %c0_4 = arith.constant 0 : index
    %3 = vector.load %arg3[%c0_3, %c0_4] : memref<1x128xf32, #tpu.memory_space<vmem>>, vector<1x128xf32>
    %4 = vector.broadcast %3 : vector<1x128xf32> to vector<8x128xf32>
    %5 = arith.addf %2, %4 : vector<8x128xf32>
    %c0_5 = arith.constant 0 : index
    %c0_6 = arith.constant 0 : index
    %6 = vector.load %arg4[%c0_5, %c0_6] : memref<8x128xf32, #tpu.memory_space<vmem>>, vector<8x128xf32>
    tpu.vector_store %arg4[%c0_5, %c0_6], %5 {strides = array<i32>} : memref<8x128xf32, #tpu.memory_space<vmem>>, vector<8x128xf32>,
    return
  }
  func.func @transform_0(%arg0: i32) -> (i32, i32) {
    %c0_i32 = arith.constant 0 : i32
    %c0_i32_0 = arith.constant 0 : i32
    return %arg0, %c0_i32 : i32, i32
  }
  func.func @transform_1(%arg0: i32) -> (i32, i32) {
    %c0_i32 = arith.constant 0 : i32
    %c0_i32_0 = arith.constant 0 : i32
    %c0_i32_1 = arith.constant 0 : i32
    return %c0_i32, %c0_i32_0 : i32, i32
  }
  func.func @transform_2(%arg0: i32) -> (i32, i32) {
    %c0_i32 = arith.constant 0 : i32
    %c0_i32_0 = arith.constant 0 : i32
    %c0_i32_1 = arith.constant 0 : i32
    return %c0_i32, %c0_i32_0 : i32, i32
  }
  func.func @transform_3(%arg0: i32) -> (i32, i32) {
    %c0_i32 = arith.constant 0 : i32
    %c0_i32_0 = arith.constant 0 : i32
    return %arg0, %c0_i32 : i32, i32
  }
}

</mosaic_0001>

<bundles_post_ra>
// kernel: _ensemble_apply.1
= control target key start
LH: loop header
LB: loop body
LE: loop exit
PB: predicated region body
PF: predicated region fallthrough
CT: control target
= control target key end

     0   :  { %8 = vsyncpa [#allocation3], 0  ;;  %s196_s12 = smov [#allocation2]   ;;  %s243_s0 = inlined_call_operand.vmem [shape: f32[8,64], index: 0, kind: input, shape index: {}]   ;;  %s244_s1 = inlined_call_operand.hbm [shape: f32[64,128], index: 1, kind: input, shape index: {}]   ;;  %s245_s2 = inlined_call_operand.vmem [shape: f32[1,128], index: 2, kind: input, shape index: {}]   ;;  %s246_s3 = inlined_call_operand.vmem [shape: f32[8,128], index: 3, kind: output, shape index: {}]  }
   0x1   :  { %s16_s13 = sshll.u32 %s196_s12, 4  ;;  %s172_s16 = scalar_lea.hbm %s244_s1, 1024  ;;  %s17_s13 = int_to_ptr.vmem [resolvable:$true] %s16_s13 }
   0x2   :  { %p173_p0 = scmp.ne.s32.totalorder %s244_s1, %s172_s16  ;;  %p176_p1 = scmp.lt.u32.totalorder %s172_s16, %s244_s1 }
   0x4   :  { %p178_p2 = pnand %p176_p1, %p173_p0 }
   0x6   :  { %181 = shalt.err (!%p178_p2)
}
   0x7   :  { %s182_s21 = scalar_lea.vmem %s17_s13, 1024  ;;  %p187_p4 = scmp.lt.s32.totalorder %s17_s13, %s17_s13 }
   0x8   :  { %p183_p3 = scmp.ne.s32.totalorder %s17_s13, %s182_s21  ;;  %p188_p5 = scmp.lt.s32.totalorder %s182_s21, %s182_s21 }
   0xa   :  { %p189_p6 = por %p188_p5, %p187_p4 }
   0xc   :  { %p190_p7 = pnand %p189_p6, %p183_p3 }
   0xe   :  { %193 = shalt.err (!%p190_p7)
}
   0xf   :  { %s197_s22 = smov 128   ;;  %s198_s23 = smov 8  }
  0x10   :  { %22 = dma.hbm_to_vmem [thread:$0]  %s244_s1, 1024, %s17_s13, [#allocation3], %s197_s22, %s197_s22, %s198_s23  }
  0x11   :  { %194 = dma.done.wait [#allocation3], 1024  }
  0x12   :  { %195 = vsyncadd [#allocation3], 4294966272  ;;  %v199_v0 = vmov 0.0|0.0   ;;  %vm200_vm0 = vmmov 0   ;;  %v201_v1 = vmov 0.0   ;;  %v29_v2 = vld [vmem:[#allocation2] sm:$0xff] }
  0x13   :  { %154 = vmatprep.subr.bf16.mxu0 %v199_v0  ;;  %151 = vmatprep.mubr.msk.f32.mxu0 %vm200_vm0, %v201_v1  ;;  %v30_v3 = vld [vmem:[#allocation2 + $0x8] sm:$0xff]  ;;  %v31_v4 = vld [vmem:[#allocation2 + $0x10] sm:$0xff]  ;;  %v32_v6 = vld [vmem:[#allocation2 + $0x18] sm:$0xff]  ;;  %vm44_vm1 = vcmask 523264  }
  0x14   :  { %v155_v5 = vpack.c.bf16 %v30_v3, %v29_v2  ;;  %v158_v7 = vpack.c.bf16 %v32_v6, %v31_v4  ;;  %v33_v8 = vld [vmem:[#allocation2 + $0x20] sm:$0xff]  ;;  %v34_v9 = vld [vmem:[#allocation2 + $0x28] sm:$0xff]  ;;  %v35_v11 = vld [vmem:[#allocation2 + $0x30] sm:$0xff] }
  0x15   :  { %v161_v10 = vpack.c.bf16 %v34_v9, %v33_v8  ;;  %v36_v12 = vld [vmem:[#allocation2 + $0x38] sm:$0xff]  ;;  %v28_v14 = vld [vmem:[%s243_s0] sm:$0xff] }
  0x16   :  { %156 = vmatpush3.bf16.msra.mxu0 %v155_v5  ;;  %v164_v13 = vpack.c.bf16 %v36_v12, %v35_v11  ;;  %v124_v15 = vld [vmem:[%s245_s2] ss:$0 sm:$0xff] }
  0x17   :  { %157 = vmatprep.subr.bf16.mxu0 %v199_v0 }
  0x1a   :  { %159 = vmatpush3.bf16.msra.mxu0 %v158_v7 }
  0x1b   :  { %160 = vmatprep.subr.bf16.mxu0 %v199_v0 }
  0x1e   :  { %162 = vmatpush3.bf16.msra.mxu0 %v161_v10 }
  0x1f   :  { %163 = vmatprep.subr.bf16.mxu0 %v199_v0 }
  0x22   :  { %165 = vmatpush3.bf16.msra.mxu0 %v164_v13 }
  0x25   :  { %152 = vmatmul.mubr.msk.f32.vlgmr.msra.gmra.mrb[0].mxu0 %vm44_vm1, %v28_v14 }
  0xf8   :  { %v114_v16 = vpop.f32.mrb[0].mxu0 }
  0xf9   :  { %v115_v17 = vadd.f32 %v124_v15, %v114_v16  ;;  %v153_v18 = vpop.f32.mrb[1].mxu0 }
  0xfb   :  { %118 = vst [vmem:[%s246_s3] sm:$0xff] %v115_v17 }
  0xfc   :  { %123 = vsyncpa [#allocation3], 1 }

</bundles_post_ra>
